<compile_context>
chip_gen: v7x
topology: tpu7x:2x2x1
jax: 0.10.0
libtpu: 0.0.40
codegen_flags: <defaults>
</compile_context>

<pallas_src>
import jax
import jax.numpy as jnp
import numpy as np
from jax.experimental import pallas as pl
from jax.experimental.pallas import tpu as pltpu


# -----------------------------------------------------------------------------
# Fast path: zero-traffic aliased pass-through (the real nn.Identity semantics).
# -----------------------------------------------------------------------------
def _noop_kernel(x_ref, o_ref):
    # Output is aliased to the input HBM buffer; the data is already in place,
    # so there is nothing to DMA and nothing to compute.
    del x_ref, o_ref


def identity(x: jax.Array) -> jax.Array:
    """Identity forward: returns x unchanged (same shape / dtype / values).

    Zero HBM<->VMEM traffic: in/out live in HBM (pl.ANY) and the output aliases
    the input buffer.  Call under jax.jit(..., donate_argnums=0) for a true
    zero-copy pass on v5e / v6e / v7x alike.
    """
    if x.size == 0:
        return x
    return pl.pallas_call(
        _noop_kernel,
        out_shape=jax.ShapeDtypeStruct(x.shape, x.dtype),
        in_specs=[pl.BlockSpec(memory_space=pl.ANY)],
        out_specs=pl.BlockSpec(memory_space=pl.ANY),
        input_output_aliases={0: 0},
        cost_estimate=pl.CostEstimate(flops=0, transcendentals=0, bytes_accessed=0),
    )(x)


# -----------------------------------------------------------------------------
# Materializing path: HBM-roofline streaming copy into a fresh buffer.
# No input_output_aliases here: this path exists precisely for callers that do
# NOT donate x, and aliasing without donation would add a second (defensive)
# full-array copy.
# -----------------------------------------------------------------------------
def _copy_kernel(x_ref, o_ref):
    o_ref[...] = x_ref[...]


# Per-tile footprint target.  (input + output) x double buffering => ~4x this in
# scoped VMEM (32 MiB), which fits under the 48 MiB limit requested below on all
# generations (v7x: 64 MiB physical; v5e/v6e: 128 MiB physical) while amortizing
# the ~0.35 us per-grid-step overhead (matters most at v7x's 3.2 TB/s HBM).
_TARGET_TILE_BYTES = 8 * 1024 * 1024
_VMEM_LIMIT_BYTES = 48 * 1024 * 1024


def _pick_width(total: int) -> int:
    """Largest lane-dense width (multiple of 128) that evenly divides total."""
    for cand in (4096, 2048, 1024, 512, 256, 128):
        if total % cand == 0:
            return cand
    return 0


def identity_copy(x: jax.Array) -> jax.Array:
    """Identity that materializes a fresh output buffer (bit-exact copy of x)."""
    orig_shape = x.shape
    total = x.size
    if total == 0:
        return x

    itemsize = jnp.dtype(x.dtype).itemsize
    # Minimum sublane multiple for this dtype (8 for f32, 16 for bf16, 32 for
    # int8/fp8) so packed dtypes keep full, unmasked vst stores.
    sub_align = max(8, 32 // itemsize)

    width = _pick_width(total)
    if width == 0:
        # Ragged element count: tile a flat (1, total) view along the lane axis
        # with a lane-dense (multiple-of-128) column tile; Pallas masks the
        # ragged tail block.  Never map the whole array as a single block.
        x2 = x.reshape(1, total)
        rows, cols = x2.shape
        tc = max(128, (_TARGET_TILE_BYTES // itemsize) // 128 * 128)
        if tc >= cols:
            tc = cols  # full dim: exempt from the 128 rule
        grid = (pl.cdiv(cols, tc),)
        block = (1, tc)
        index_map = lambda i: (0, i)
    else:
        # Lane-dense 2-D view: last dim is a large multiple of 128 so stores are
        # full-width vst rather than masked partial stores.
        x2 = x.reshape(total // width, width)
        rows, cols = x2.shape
        tm = max(sub_align, _TARGET_TILE_BYTES // (cols * itemsize))
        tm = (tm // sub_align) * sub_align
        if tm >= rows:
            if rows >= 2 * sub_align:
                # Keep at least 2 grid steps so ("parallel",) can split the work
                # across both TensorCores on v7x (neutral on v5e/v6e).
                tm = ((rows // 2) // sub_align) * sub_align
            else:
                tm = rows  # full dim: exempt from the sublane-multiple rule
        grid = (pl.cdiv(rows, tm),)
        block = (tm, cols)
        index_map = lambda i: (i, 0)

    out2 = pl.pallas_call(
        _copy_kernel,
        out_shape=jax.ShapeDtypeStruct((rows, cols), x2.dtype),
        grid=grid,
        in_specs=[pl.BlockSpec(block, index_map)],
        out_specs=pl.BlockSpec(block, index_map),
        compiler_params=pltpu.CompilerParams(
            dimension_semantics=("parallel",),
            vmem_limit_bytes=_VMEM_LIMIT_BYTES,
        ),
        cost_estimate=pl.CostEstimate(
            flops=0, transcendentals=0, bytes_accessed=2 * total * itemsize
        ),
    )(x2)
    return out2.reshape(orig_shape)


if __name__ == "__main__":
    key = jax.random.PRNGKey(0)
    x = jax.random.normal(key, (2, 4, 16, 16), dtype=jnp.float32)

    # Host-side reference copy (x itself is donated further below).
    x_np = np.asarray(x)

    # 1) Fast path, no donation: one defensive copy, kernel itself moves 0 bytes.
    y0 = identity(x)
    jax.block_until_ready(y0)
    assert y0.shape == x_np.shape and y0.dtype == x.dtype
    assert np.array_equal(np.asarray(y0), x_np), "identity (no donation) mismatch"

    # 2) Fast path with donation: true zero-copy aliased pass-through.
    identity_donated = jax.jit(identity, donate_argnums=0)
    y1 = identity_donated(x)  # x's HBM buffer is reused for y1
    jax.block_until_ready(y1)
    assert y1.shape == x_np.shape and y1.dtype == jnp.float32
    assert np.array_equal(np.asarray(y1), x_np), "identity (donated) mismatch"

    # 3) Materializing copy path: fresh output buffer, tuned streaming copy.
    y2 = identity_copy(y1)
    jax.block_until_ready(y2)
    assert y2.shape == x_np.shape and y2.dtype == jnp.float32
    assert np.array_equal(np.asarray(y2), x_np), "identity_copy mismatch"

    print("KERNEL_OK")
</pallas_src>

<mosaic_0001>
module attributes {stable_mosaic.version = 11 : i64} {
  func.func @_noop_kernel(%arg0: memref<2x4x16x16xf32, #tpu.memory_space<any>>, %arg1: memref<2x4x16x16xf32, #tpu.memory_space<any>>) attributes {dimension_semantics = [], scalar_prefetch = 0 : i64, scratch_operands = 0 : i64, tpu.core_type = #tpu.core_type<tc>} {
    return
  }
}

</mosaic_0001>

<bundles_post_ra>
// kernel: tpu_custom_call.1
= control target key start
LH: loop header
LB: loop body
LE: loop exit
PB: predicated region body
PF: predicated region fallthrough
CT: control target
= control target key end

     0   :  { %s16_s0 = inlined_call_operand.hbm [shape: f32[2,4,16,16], index: 0, kind: input, shape index: {}, may-alias: {0,1}]   ;;  %s17_s1 = inlined_call_operand.hbm [shape: f32[2,4,16,16], index: 1, kind: output, shape index: {}, may-alias: {0,1}]  }

</bundles_post_ra>
